<compile_context>
chip_gen: v7x
topology: tpu7x:2x2x1
jax: 0.10.0
libtpu: 0.0.40
codegen_flags: <defaults>
</compile_context>

<pallas_src>
import functools
import math

import jax
import jax.numpy as jnp
from jax import lax
from jax.experimental import pallas as pl
from jax.experimental.pallas import tpu as pltpu


# Large finite negative used for masking: avoids any -inf - (-inf) = NaN hazard
# while still underflowing to exactly 0 after exp(s - m).
NEG_INF = -1e30


def _fused_attn_kernel(x_ref, wq_ref, wk_ref, wv_ref, o_ref,
                       q_sc, k_sc, v_sc, *, tq):
    """One (batch, q_tile) grid step of fused QKV projection + causal attention."""
    qi = pl.program_id(1)

    # ---- Q/K/V projection for the whole sequence of this batch element ----
    # Runs only on the first q tile of each batch element; results stay
    # resident in VMEM scratch for every subsequent q tile of the same batch.
    @pl.when(qi == 0)
    def _project():
        x_all = x_ref[0].astype(wq_ref.dtype)                       # (T, C) bf16
        # W_q was pre-scaled by 1/sqrt(H) in the wrapper.
        q_sc[...] = jnp.dot(x_all, wq_ref[...],
                            preferred_element_type=jnp.float32).astype(q_sc.dtype)
        k_sc[...] = jnp.dot(x_all, wk_ref[...],
                            preferred_element_type=jnp.float32).astype(k_sc.dtype)
        v_sc[...] = jnp.dot(x_all, wv_ref[...],
                            preferred_element_type=jnp.float32).astype(v_sc.dtype)

    # ---- causal attention for this q tile over the full kv row ----
    start = pl.multiple_of(qi * tq, tq)
    q = q_sc[pl.ds(start, tq), :]                                   # (tq, H) bf16
    k = k_sc[...]                                                   # (T,  H) bf16
    v = v_sc[...]                                                   # (T,  H) bf16

    # QK^T by contracting the head axis of both operands (no k transpose / XLU),
    # f32 accumulation on the MXU.
    s = lax.dot_general(q, k, (((1,), (1,)), ((), ())),
                        preferred_element_type=jnp.float32)         # (tq, T)

    # Causal mask: every row contains its own diagonal, so no row is ever
    # fully masked (no NaN hazard).
    row = qi * tq + lax.broadcasted_iota(jnp.int32, s.shape, 0)
    col = lax.broadcasted_iota(jnp.int32, s.shape, 1)
    s = jnp.where(row >= col, s, NEG_INF)

    # Plain row softmax (all f32): the full kv extent of each row is present,
    # so no online-softmax machinery is needed.
    m = jnp.max(s, axis=-1, keepdims=True)                          # (tq, 1)
    p = jnp.exp(s - m)                                              # (tq, T)
    l = jnp.sum(p, axis=-1, keepdims=True)                          # (tq, 1)
    acc = jnp.dot(p.astype(v.dtype), v,
                  preferred_element_type=jnp.float32)               # (tq, H)
    inv_l = pl.reciprocal(l, approx=True)                           # EUP slot, ~free
    o_ref[0] = (acc * inv_l).astype(o_ref.dtype)


def _ceil_to(x, m):
    return -(-x // m) * m


def _vmem_limit_bytes(T, C, H, tq):
    """Derive the scoped-VMEM request from the actual (lane/sublane-padded)
    tile shapes instead of hard-coding a number (v7x only has 64 MiB physical)."""
    def padded(rows, cols, itemsize):
        return _ceil_to(rows, 8) * _ceil_to(cols, 128) * itemsize

    total = 0
    total += 2 * padded(T, C, 4)          # x block (f32), double-buffered
    total += 2 * 3 * padded(C, H, 2)      # W_q / W_k / W_v blocks (bf16)
    total += 2 * padded(tq, H, 4)         # output block, double-buffered
    total += 3 * padded(T, H, 2)          # Q/K/V VMEM scratch (bf16)
    total += 8 * padded(tq, T, 4)         # s / p / mask / iota temporaries + headroom
    return min(max(2 * total, 4 << 20), 48 << 20)


def single_attention_head(x, w_key, w_query, w_value, *, head_size, block_q=512):
    """x: (B, T, C) f32; w_*: (C, H) f32 (stored transposed vs nn.Linear).

    Returns (B, T, H) in x.dtype, matching the PyTorch module's forward
    (eval-mode dropout).
    """
    B, T, C = x.shape
    H = head_size
    assert w_key.shape == (C, H) and w_query.shape == (C, H) and w_value.shape == (C, H)

    tq = min(block_q, T)
    if T % tq != 0:
        raise ValueError(f"T={T} must be divisible by the q tile size {tq}")
    nt = T // tq

    # Fold the 1/sqrt(H) scale into W_q at trace time (free) and cast the tiny,
    # VMEM-resident weights to bf16 for the MXU.
    w_q = (w_query * (head_size ** -0.5)).astype(jnp.bfloat16)
    w_k = w_key.astype(jnp.bfloat16)
    w_v = w_value.astype(jnp.bfloat16)

    kernel = functools.partial(_fused_attn_kernel, tq=tq)

    return pl.pallas_call(
        kernel,
        out_shape=jax.ShapeDtypeStruct((B, T, H), x.dtype),
        grid_spec=pltpu.PrefetchScalarGridSpec(
            num_scalar_prefetch=0,
            grid=(B, nt),
            in_specs=[
                # Full sequence of one batch element; block index is constant
                # across qi, so it is DMA'd only once per batch element.
                pl.BlockSpec((1, T, C), lambda b, qi: (b, 0, 0)),
                pl.BlockSpec((C, H), lambda b, qi: (0, 0)),   # W_q (resident, pre-scaled)
                pl.BlockSpec((C, H), lambda b, qi: (0, 0)),   # W_k (resident)
                pl.BlockSpec((C, H), lambda b, qi: (0, 0)),   # W_v (resident)
            ],
            out_specs=pl.BlockSpec((1, tq, H), lambda b, qi: (b, qi, 0)),
            scratch_shapes=[
                pltpu.VMEM((T, H), jnp.bfloat16),   # Q (whole sequence)
                pltpu.VMEM((T, H), jnp.bfloat16),   # K
                pltpu.VMEM((T, H), jnp.bfloat16),   # V
            ],
        ),
        compiler_params=pltpu.CompilerParams(
            # Batch shards across TensorCores (v7x has 2 TCs) and per-step work
            # is uniform, so the split is balanced.  q tiles stay sequential
            # ("arbitrary") because the projection scratch is filled at qi == 0.
            dimension_semantics=("parallel", "arbitrary"),
            vmem_limit_bytes=_vmem_limit_bytes(T, C, H, tq),
        ),
    )(x, w_q, w_k, w_v)


def _reference(x, w_key, w_query, w_value, head_size):
    k = x @ w_key
    q = x @ w_query
    v = x @ w_value
    w = (q @ jnp.swapaxes(k, -2, -1)) * (head_size ** -0.5)
    T = x.shape[1]
    tril = jnp.tril(jnp.ones((T, T), dtype=bool))
    w = jnp.where(tril, w, -jnp.inf)
    w = jax.nn.softmax(w, axis=-1)
    return w @ v


if __name__ == "__main__":
    # Config consistent with the module: n_embed=32, head_size=16, block_size >= T.
    B, T, C, H = 2, 8, 32, 16

    key = jax.random.PRNGKey(0)
    kx, kk, kq, kv = jax.random.split(key, 4)

    x = jax.random.normal(kx, (B, T, C), dtype=jnp.float32)
    # nn.Linear default init: U(-1/sqrt(C), 1/sqrt(C)); stored here as (C, H).
    bound = 1.0 / math.sqrt(C)
    w_key = jax.random.uniform(kk, (C, H), minval=-bound, maxval=bound, dtype=jnp.float32)
    w_query = jax.random.uniform(kq, (C, H), minval=-bound, maxval=bound, dtype=jnp.float32)
    w_value = jax.random.uniform(kv, (C, H), minval=-bound, maxval=bound, dtype=jnp.float32)

    out = single_attention_head(x, w_key, w_query, w_value, head_size=H)
    out = jax.block_until_ready(out)

    ref = _reference(x, w_key, w_query, w_value, H)
    assert out.shape == (B, T, H)
    assert not bool(jnp.any(jnp.isnan(out)))
    # bf16 MXU operands (f32 accumulation) + approx reciprocal introduce ~1e-3
    # level deviation vs the pure-f32 reference.
    assert jnp.allclose(out, ref, atol=2e-2, rtol=2e-2), "mismatch vs pure-JAX reference"

    print("KERNEL_OK")
</pallas_src>

<mosaic_0001>
module attributes {stable_mosaic.version = 11 : i64} {
  func.func @_fused_attn_kernel(%arg0: i32, %arg1: i32, %arg2: memref<1x8x32xf32, #tpu.memory_space<vmem>>, %arg3: memref<32x16xbf16, #tpu.memory_space<vmem>>, %arg4: memref<32x16xbf16, #tpu.memory_space<vmem>>, %arg5: memref<32x16xbf16, #tpu.memory_space<vmem>>, %arg6: memref<1x8x16xf32, #tpu.memory_space<vmem>>, %arg7: memref<8x16xbf16, #tpu.memory_space<vmem>>, %arg8: memref<8x16xbf16, #tpu.memory_space<vmem>>, %arg9: memref<8x16xbf16, #tpu.memory_space<vmem>>) attributes {dimension_semantics = [#tpu.dimension_semantics<parallel>, #tpu.dimension_semantics<arbitrary>], iteration_bounds = array<i64: 2, 1>, scalar_prefetch = 0 : i64, scratch_operands = 3 : i64, tpu.core_type = #tpu.core_type<tc>, window_params = [{transform_indices = @transform_0, window_bounds = array<i64: 1, 8, 32>}, {pipeline_mode = #tpu.pipeline_mode<synchronous>, transform_indices = @transform_1, window_bounds = array<i64: 32, 16>}, {pipeline_mode = #tpu.pipeline_mode<synchronous>, transform_indices = @transform_2, window_bounds = array<i64: 32, 16>}, {pipeline_mode = #tpu.pipeline_mode<synchronous>, transform_indices = @transform_3, window_bounds = array<i64: 32, 16>}, {transform_indices = @transform_4, window_bounds = array<i64: 1, 8, 16>}]} {
    %c0_i32 = arith.constant 0 : i32
    %0 = arith.cmpi eq, %arg1, %c0_i32 : i32
    %1 = arith.extui %0 : i1 to i32
    %c0_i32_0 = arith.constant 0 : i32
    %2 = arith.cmpi ne, %1, %c0_i32_0 : i32
    scf.if %2 {
      %c0_13 = arith.constant 0 : index
      %c0_14 = arith.constant 0 : index
      %c0_15 = arith.constant 0 : index
      %33 = vector.load %arg2[%c0_13, %c0_14, %c0_15] : memref<1x8x32xf32, #tpu.memory_space<vmem>>, vector<1x8x32xf32>
      %34 = vector.shape_cast %33 : vector<1x8x32xf32> to vector<8x32xf32>
      %35 = arith.truncf %34 : vector<8x32xf32> to vector<8x32xbf16>
      %c0_16 = arith.constant 0 : index
      %c0_17 = arith.constant 0 : index
      %36 = vector.load %arg3[%c0_16, %c0_17] : memref<32x16xbf16, #tpu.memory_space<vmem>>, vector<32x16xbf16>
      %cst_18 = arith.constant dense<0.000000e+00> : vector<8x16xf32>
      %37 = tpu.matmul %35, %36, %cst_18 {dimension_numbers = #tpu.dot_dimension_numbers<[1], [0], [0], [1], [0, 0, 1, 1], [], []>} : vector<8x32xbf16>, vector<32x16xbf16>, vector<8x16xf32> -> vector<8x16xf32>
      %38 = arith.truncf %37 : vector<8x16xf32> to vector<8x16xbf16>
      %c0_19 = arith.constant 0 : index
      %c0_20 = arith.constant 0 : index
      %39 = vector.load %arg7[%c0_19, %c0_20] : memref<8x16xbf16, #tpu.memory_space<vmem>>, vector<8x16xbf16>
      tpu.vector_store %arg7[%c0_19, %c0_20], %38 {strides = array<i32>} : memref<8x16xbf16, #tpu.memory_space<vmem>>, vector<8x16xbf16>,
      %c0_21 = arith.constant 0 : index
      %c0_22 = arith.constant 0 : index
      %40 = vector.load %arg4[%c0_21, %c0_22] : memref<32x16xbf16, #tpu.memory_space<vmem>>, vector<32x16xbf16>
      %cst_23 = arith.constant dense<0.000000e+00> : vector<8x16xf32>
      %41 = tpu.matmul %35, %40, %cst_23 {dimension_numbers = #tpu.dot_dimension_numbers<[1], [0], [0], [1], [0, 0, 1, 1], [], []>} : vector<8x32xbf16>, vector<32x16xbf16>, vector<8x16xf32> -> vector<8x16xf32>
      %42 = arith.truncf %41 : vector<8x16xf32> to vector<8x16xbf16>
      %c0_24 = arith.constant 0 : index
      %c0_25 = arith.constant 0 : index
      %43 = vector.load %arg8[%c0_24, %c0_25] : memref<8x16xbf16, #tpu.memory_space<vmem>>, vector<8x16xbf16>
      tpu.vector_store %arg8[%c0_24, %c0_25], %42 {strides = array<i32>} : memref<8x16xbf16, #tpu.memory_space<vmem>>, vector<8x16xbf16>,
      %c0_26 = arith.constant 0 : index
      %c0_27 = arith.constant 0 : index
      %44 = vector.load %arg5[%c0_26, %c0_27] : memref<32x16xbf16, #tpu.memory_space<vmem>>, vector<32x16xbf16>
      %cst_28 = arith.constant dense<0.000000e+00> : vector<8x16xf32>
      %45 = tpu.matmul %35, %44, %cst_28 {dimension_numbers = #tpu.dot_dimension_numbers<[1], [0], [0], [1], [0, 0, 1, 1], [], []>} : vector<8x32xbf16>, vector<32x16xbf16>, vector<8x16xf32> -> vector<8x16xf32>
      %46 = arith.truncf %45 : vector<8x16xf32> to vector<8x16xbf16>
      %c0_29 = arith.constant 0 : index
      %c0_30 = arith.constant 0 : index
      %47 = vector.load %arg9[%c0_29, %c0_30] : memref<8x16xbf16, #tpu.memory_space<vmem>>, vector<8x16xbf16>
      tpu.vector_store %arg9[%c0_29, %c0_30], %46 {strides = array<i32>} : memref<8x16xbf16, #tpu.memory_space<vmem>>, vector<8x16xbf16>,
    } else {
    }
    %c8_i32 = arith.constant 8 : i32
    %3 = arith.muli %arg1, %c8_i32 : i32
    %4 = tpu.assume_multiple %3, 8 : i32
    %5 = arith.index_cast %4 : i32 to index
    %c0 = arith.constant 0 : index
    %6 = vector.load %arg7[%5, %c0] : memref<8x16xbf16, #tpu.memory_space<vmem>>, vector<8x16xbf16>
    %c0_1 = arith.constant 0 : index
    %c0_2 = arith.constant 0 : index
    %7 = vector.load %arg8[%c0_1, %c0_2] : memref<8x16xbf16, #tpu.memory_space<vmem>>, vector<8x16xbf16>
    %c0_3 = arith.constant 0 : index
    %c0_4 = arith.constant 0 : index
    %8 = vector.load %arg9[%c0_3, %c0_4] : memref<8x16xbf16, #tpu.memory_space<vmem>>, vector<8x16xbf16>
    %cst = arith.constant dense<0.000000e+00> : vector<8x8xf32>
    %9 = tpu.matmul %6, %7, %cst {dimension_numbers = #tpu.dot_dimension_numbers<[1], [1], [0], [0], [0, 0, 1, 0], [], []>} : vector<8x16xbf16>, vector<8x16xbf16>, vector<8x8xf32> -> vector<8x8xf32>
    %c8_i32_5 = arith.constant 8 : i32
    %10 = arith.muli %arg1, %c8_i32_5 : i32
    %11 = tpu.iota {dimensions = array<i32: 0>} : vector<8x8xi32>
    %12 = vector.broadcast %10 : i32 to vector<8x8xi32>
    %13 = arith.addi %12, %11 : vector<8x8xi32>
    %14 = tpu.iota {dimensions = array<i32: 1>} : vector<8x8xi32>
    %15 = arith.cmpi sge, %13, %14 : vector<8x8xi32>
    %cst_6 = arith.constant -1.000000e+30 : f32
    %16 = vector.broadcast %cst_6 : f32 to vector<8x8xf32>
    %17 = arith.select %15, %9, %16 : vector<8x8xi1>, vector<8x8xf32>
    %cst_7 = arith.constant dense<0xFF800000> : vector<8xf32>
    %18 = vector.multi_reduction <maximumf>, %17, %cst_7 [1] : vector<8x8xf32> to vector<8xf32>
    %19 = vector.shape_cast %18 : vector<8xf32> to vector<8x1xf32>
    %20 = vector.broadcast %19 : vector<8x1xf32> to vector<8x8xf32>
    %21 = arith.subf %17, %20 : vector<8x8xf32>
    %22 = math.exp %21 : vector<8x8xf32>
    %cst_8 = arith.constant dense<0.000000e+00> : vector<8xf32>
    %23 = vector.multi_reduction <add>, %22, %cst_8 [1] : vector<8x8xf32> to vector<8xf32>
    %24 = vector.shape_cast %23 : vector<8xf32> to vector<8x1xf32>
    %25 = arith.truncf %22 : vector<8x8xf32> to vector<8x8xbf16>
    %cst_9 = arith.constant dense<0.000000e+00> : vector<8x16xf32>
    %26 = tpu.matmul %25, %8, %cst_9 {dimension_numbers = #tpu.dot_dimension_numbers<[1], [0], [0], [1], [0, 0, 1, 1], [], []>} : vector<8x8xbf16>, vector<8x16xbf16>, vector<8x16xf32> -> vector<8x16xf32>
    %27 = tpu.reciprocal %24 {approx = true} : vector<8x1xf32> -> vector<8x1xf32>
    %28 = vector.broadcast %27 : vector<8x1xf32> to vector<8x16xf32>
    %29 = arith.mulf %26, %28 : vector<8x16xf32>
    %c0_10 = arith.constant 0 : index
    %c0_11 = arith.constant 0 : index
    %c0_12 = arith.constant 0 : index
    %30 = vector.load %arg6[%c0_10, %c0_11, %c0_12] : memref<1x8x16xf32, #tpu.memory_space<vmem>>, vector<1x8x16xf32>
    %31 = vector.shape_cast %30 : vector<1x8x16xf32> to vector<8x16xf32>
    %32 = vector.shape_cast %29 : vector<8x16xf32> to vector<1x8x16xf32>
    tpu.vector_store %arg6[%c0_10, %c0_11, %c0_12], %32 {strides = array<i32>} : memref<1x8x16xf32, #tpu.memory_space<vmem>>, vector<1x8x16xf32>,
    return
  }
  func.func @transform_0(%arg0: i32, %arg1: i32) -> (i32, i32, i32) {
    %c0_i32 = arith.constant 0 : i32
    %c0_i32_0 = arith.constant 0 : i32
    %c0_i32_1 = arith.constant 0 : i32
    return %arg0, %c0_i32, %c0_i32_0 : i32, i32, i32
  }
  func.func @transform_1(%arg0: i32, %arg1: i32) -> (i32, i32) {
    %c0_i32 = arith.constant 0 : i32
    %c0_i32_0 = arith.constant 0 : i32
    %c0_i32_1 = arith.constant 0 : i32
    return %c0_i32, %c0_i32_0 : i32, i32
  }
  func.func @transform_2(%arg0: i32, %arg1: i32) -> (i32, i32) {
    %c0_i32 = arith.constant 0 : i32
    %c0_i32_0 = arith.constant 0 : i32
    %c0_i32_1 = arith.constant 0 : i32
    return %c0_i32, %c0_i32_0 : i32, i32
  }
  func.func @transform_3(%arg0: i32, %arg1: i32) -> (i32, i32) {
    %c0_i32 = arith.constant 0 : i32
    %c0_i32_0 = arith.constant 0 : i32
    %c0_i32_1 = arith.constant 0 : i32
    return %c0_i32, %c0_i32_0 : i32, i32
  }
  func.func @transform_4(%arg0: i32, %arg1: i32) -> (i32, i32, i32) {
    %c0_i32 = arith.constant 0 : i32
    %c0_i32_0 = arith.constant 0 : i32
    return %arg0, %arg1, %c0_i32 : i32, i32, i32
  }
}

</mosaic_0001>

<bundles_post_ra>
// kernel: tpu_custom_call.1
= control target key start
LH: loop header
LB: loop body
LE: loop exit
PB: predicated region body
PF: predicated region fallthrough
CT: control target
= control target key end

     0   :  { %9 = vsyncpa [#allocation6], 0  ;;  %s992_s0 = inlined_call_operand.vmem [shape: f32[2,8,32], index: 0, kind: input, shape index: {}]   ;;  %s993_s1 = inlined_call_operand.vmem [shape: bf16[32,16], index: 1, kind: input, shape index: {}]   ;;  %s994_s2 = inlined_call_operand.vmem [shape: bf16[32,16], index: 2, kind: input, shape index: {}]   ;;  %s995_s3 = inlined_call_operand.vmem [shape: bf16[32,16], index: 3, kind: input, shape index: {}]   ;;  %s996_s4 = inlined_call_operand.hbm [shape: f32[2,8,16], index: 4, kind: output, shape index: {}]  }
   0x1   :  { %11 = vsyncpa [#allocation6 + $0x1], 0  ;;  %s848_s15 = smov 0   ;;  %s850_s16 = smov 0  }
   0x2   :  { %s852_s17 = smov 0   ;;  %s854_s18 = smov 0  }
   0x3   :  { %s856_s19 = smov 0   ;;  %s858_s20 = smov 0  }
   0x4 LB: > { %s602_s21 = sadd.s32 4294967295, %s818_s20   ;;  %s603_s22 = sadd.s32 4294967294, %s818_s20   ;;  %s818_s20 = sphi %s858_s20, %s17_s20   ;;  %s814_s19 = sphi %s856_s19, %s1003_s19   ;;  %s810_s18 = sphi %s854_s18, %s1002_s18   ;;  %s806_s17 = sphi %s852_s17, %s1001_s17   ;;  %s802_s16 = sphi %s850_s16, %s1000_s16   ;;  %s798_s15 = sphi %s848_s15, %s999_s15  }
   0x5   : > { %s29_s23 = sadd.s32 1, %s814_s19  ;;  %s127_s24 = sadd.s32 1, %s806_s17 }
   0x6   : > { %p31_p0 = scmp.ge.s32.totalorder %s29_s23, 2  ;;  %p137_p1 = scmp.ne.s32.totalorder %s806_s17, %s802_s16 }
   0x7   : > { %p138_p2 = scmp.eq.s32.totalorder %s602_s21, 1  ;;  %p143_p3 = scmp.ne.s32.totalorder %s802_s16, %s798_s15 }
   0x8   : > { %s1005_s23 = smov (%p31_p0, %s29_s23), 0  ;;  %p144_p5 = scmp.eq.s32.totalorder %s603_s22, 1 }
   0x9   : > { %p888_p4 = por %p138_p2, %p137_p1  ;;  %s122_s26 = ssub.s32 %s814_s19, %s1005_s23 }
   0xa   : > { %p606_p6 = scmp.ge.s32.totalorder %s818_s20, 1  ;;  %p125_p7 = scmp.eq.s32.totalorder %s122_s26, 0 }
   0xb   : > { %p895_p8 = por %p144_p5, %p143_p3  ;;  %p178_p9 = scmp.lt.s32.totalorder %s818_s20, 3 }
   0xc   : > { %s901_s28 = scalar_select %p125_p7, %s806_s17, %s127_s24  }
   0xd   : > { %p179_p10 = pnand %p606_p6, %p178_p9 }
   0xe   : > { %v730_v0 = vld [vmem:[%s994_s2] sm:$0xff] (!%p179_p10)   ;;  %v820_v1 = vmov (!%p179_p10), 0.0   ;;  %v731_v2 = vld [vmem:[%s994_s2 + $0x8] sm:$0xff] (!%p179_p10)   ;;  %vm821_vm0 = vmmov (!%p179_p10), 0   ;;  %p203_p11 = scmp.lt.s32.totalorder (!%p179_p10), %s810_s18, 1  ;;  %vm230_vm1 = vcmask (!%p179_p10), 261120   ;;  %v448_v27 = vlaneseq (!%p179_p10) }
   0xf   : > { %182 = sbr.rel (%p179_p10) target bundleno = 860 (0x35c), region = 36  ;;  %645 = vmatprep.subr.bf16.mxu1 (!%p179_p10), %v820_v1  ;;  %637 = vmatprep.subr.bf16.mxu0 (!%p179_p10), %v820_v1  ;;  %v732_v3 = vld [vmem:[%s993_s1] sm:$0xff] (!%p179_p10)   ;;  %v733_v4 = vld [vmem:[%s993_s1 + $0x8] sm:$0xff] (!%p179_p10)   ;;  %vm275_vm2 = vcmask (!%p179_p10), 125952   ;;  %vm401_vm3 = vcmask (!%p179_p10), 130048   ;;  %vm456_vm5 = vcmask (!%p179_p10), 64512  }
  0x10   : > { %646 = vmatpush3.bf16.msra.mxu1 (!%p179_p10), %v730_v0  ;;  %649 = vmatprep.mubr.msk.bf16.mxu1 (!%p179_p10), %vm821_vm0, %v820_v1  ;;  %v734_v7 = vld [vmem:[%s995_s3] sm:$0xff] (!%p179_p10)   ;;  %v735_v8 = vld [vmem:[%s995_s3 + $0x8] sm:$0xff] (!%p179_p10)   ;;  %v449_v28 = vshrl.u32 (!%p179_p10), %v448_v27, 7  ;;  %v453_v29 = vand.u32 (!%p179_p10), 127, %v448_v27  ;;  %vm470_vm6 = vcmask (!%p179_p10), 1043456   ;;  %s200_s30 = sand.u32 (!%p179_p10), 1, %s802_s16  }
  0x11   : > { %647 = vmatprep.subr.bf16.mxu1 (!%p179_p10), %v820_v1  ;;  %641 = vmatprep.mubr.msk.bf16.mxu0 (!%p179_p10), %vm821_vm0, %v820_v1  ;;  %s607_s5 = sshll.u32 (!%p179_p10), %s200_s30, 3  ;;  %s621_s6 = sshll.u32 (!%p179_p10), %s810_s18, 7 }
  0x12   : > { %638 = vmatpush3.bf16.msra.mxu0 (!%p179_p10), %v732_v3  ;;  %vm454_vm4 = vcmp.ge.s32.totalorder (!%p179_p10), %v449_v28, %v453_v29  ;;  %s202_s7 = scalar_lea.vmem (!%p179_p10), [#allocation5], %s607_s5  ;;  %s944_s11 = scalar_lea.hbm (!%p179_p10), %s996_s4, %s621_s6 }
  0x13   : > { %639 = vmatprep.subr.bf16.mxu0 (!%p179_p10), %v820_v1  ;;  %s532_s8 = sshll.u32 (!%p179_p10), %s202_s7, 4  ;;  %s822_s13 = smov (!%p179_p10), [#allocation5]   ;;  %s946_s8 = int_to_ptr.vmem [resolvable:$true] %s532_s8 }
  0x14   : > { %648 = vmatpush3.bf16.msra.mxu1 (!%p179_p10), %v731_v2  ;;  %s744_s14 = sshll.u32 (!%p179_p10), %s822_s13, 4  ;;  %s745_s14 = int_to_ptr.vmem [resolvable:$false] %s744_s14 }
  0x15   : > { %661 = vmatprep.subr.bf16.mxu1 (!%p179_p10), %v820_v1  ;;  %p747_p1 = scmp.lt.s32.totalorder (!%p179_p10), %s946_s8, %s745_s14 }
  0x16   : > { %s204_s9 = scalar_select %p203_p11, %s810_s18, 1  ;;  %640 = vmatpush3.bf16.msra.mxu0 %v733_v4 }
  0x17   : > { %653 = vmatprep.subr.bf16.mxu0 %v820_v1  ;;  %s518_s18 = scalar_lea.sflag [#allocation6], %s200_s30 }
  0x18   : > { %s608_s12 = sshll.u32 %s204_s9, 3 }
  0x19   : > { %s206_s21 = scalar_lea.vmem %s992_s0, %s608_s12  ;;  %s740_s12 = scalar_lea.vmem %s946_s8, 128 }
  0x1a   : > { %v212_v5 = vld [vmem:[%s206_s21] sm:$0xff]  ;;  %p741_p12 = scmp.ne.s32.totalorder %s946_s8, %s740_s12  ;;  %s746_s21 = scalar_lea.vmem %s745_s14, 256 }
  0x1b   : > { %v213_v6 = vpack.c.bf16 %v212_v5, %v212_v5  ;;  %p748_p2 = scmp.lt.s32.totalorder %s746_s21, %s740_s12 }
  0x1c   : > { %p742_p13 = pnand %p741_p12, %p888_p4 }
  0x1d   : > { %650 = vmatmul.mubr.msk.bf16.vlgmr.msra.gmra.mrb[0].mxu1 %vm230_vm1, %v213_v6  ;;  %642 = vmatmul.mubr.msk.bf16.vlgmr.msra.gmra.mrb[0].mxu0 %vm230_vm1, %v213_v6  ;;  %p749_p3 = por %p748_p2, %p747_p1 }
  0x1e   : > { %663 = vmatprep.mubr.msk.bf16.mxu1 %vm821_vm0, %v820_v1  ;;  %657 = vmatprep.mubr.msk.bf16.mxu0 %vm821_vm0, %v820_v1  ;;  %p743_p0 = pneg %p742_p13 }
  0x1f   : > { %654 = vmatpush3.bf16.msra.mxu0 %v734_v7 }
  0x20   : > { %655 = vmatprep.subr.bf16.mxu0 %v820_v1  ;;  %p750_p5 = pnand %p749_p3, %p743_p0 }
  0x23   : > { %656 = vmatpush3.bf16.msra.mxu0 %v735_v8 }
  0x24   : > { %667 = vmatprep.subr.bf16.mxu0 %v820_v1 }
  0x26   : > { %658 = vmatmul.mubr.msk.bf16.vlgmr.msra.gmra.mrb[4].mxu0 %vm230_vm1, %v213_v6 }
  0x27   : > { %669 = vmatprep.mubr.msk.bf16.mxu0 %vm821_vm0, %v820_v1 }
  0xf0   : > { %v327_v9 = vpop.f32.mrb[0].mxu1  ;;  %v268_v10 = vpop.f32.mrb[0].mxu0 }
  0xf1   : > { %v333_v11 = vpack.c.bf16 %v327_v9, %v327_v9  ;;  %v651_v12 = vpop.f32.mrb[1].mxu1  ;;  %v274_v13 = vpack.c.bf16 %v268_v10, %v268_v10  ;;  %v643_v14 = vpop.f32.mrb[1].mxu0 }
  0xf2   : > { %v330_v15 = vpop.f32.mrb[2].mxu1  ;;  %v271_v16 = vpop.f32.mrb[2].mxu0 }
  0xf3   : > { %334 = vst.msk [vmem:[#allocation3] sm:$0xf] %vm275_vm2, %v333_v11  ;;  %v652_v17 = vpop.f32.mrb[3].mxu1  ;;  %276 = vst.msk [vmem:[#allocation2] sm:$0xf] %vm275_vm2, %v274_v13  ;;  %v644_v18 = vpop.f32.mrb[3].mxu0 }
  0xf9   : > { %v385_v22 = vpop.f32.mrb[4].mxu0 }
  0xfa   : > { %v399_v19 = vld [vmem:[#allocation3] sm:$0xf]  ;;  %v398_v21 = vld [vmem:[#allocation2] sm:$0xf]  ;;  %v391_v23 = vpack.c.bf16 %v385_v22, %v385_v22  ;;  %v659_v24 = vpop.f32.mrb[5].mxu0 }
  0xfb   : > { %v406_v20 = vsel %vm401_vm3, %v399_v19, 0  ;;  %v388_v25 = vpop.f32.mrb[6].mxu0 }
  0xfc   : > { %662 = vmatpush3.bf16.xpose.msra.mxu1 %v406_v20  ;;  %392 = vst.msk [vmem:[#allocation4] sm:$0xf] %vm275_vm2, %v391_v23  ;;  %v660_v26 = vpop.f32.mrb[7].mxu0 }
 0x103   : > { %664 = vmatmul.mubr.msk.bf16.vlgmr.msra.gmra.mrb[4].mxu1 %vm401_vm3, %v398_v21  ;;  %v400_v36 = vld [vmem:[#allocation4] sm:$0xf] }
 0x104   : > { %v472_v37 = vsel %vm470_vm6, %v400_v36, 0 }
 0x105   : > { %668 = vmatpush3.bf16.msra.mxu0 %v472_v37 }
 0x1d6   : > { %v442_v30 = vpop.f32.mrb[4].mxu1 }
 0x1d7   : > { %v455_v31 = vsel %vm454_vm4, %v442_v30, -1e+30  ;;  %v665_v32 = vpop.f32.mrb[5].mxu1 }
 0x1d8   : > { %v445_v33 = vpop.f32.mrb[6].mxu1  ;;  %v457_v34 = vsel %vm456_vm5, %v455_v31, -inf }
 0x1d9   : > { %458 = vmax.xlane.f32.xlu0 %v457_v34  ;;  %v666_v35 = vpop.f32.mrb[7].mxu1 }
 0x266   : > { %v459_v38 = vpop.xlane.xlu0 %458 }
 0x267   : > { %v460_v39 = vsub.f32 %v455_v31, %v459_v38 }
 0x269   : > { %v461_v40 = vmul.f32 1.442695, %v460_v39 }
 0x26b   : > { %736 = vpow2.f32 %v461_v40 }
 0x275   : > { %v737_v41 = vpop.eup %736 }
 0x276   : > { %v463_v42 = vsel %vm456_vm5, %v737_v41, 0.0  ;;  %v466_v43 = vpack.c.bf16 %v737_v41, %v737_v41 }
 0x277   : > { %464 = vadd.xlane.f32.xlu0 %v463_v42 }
 0x278   : > { %670 = vmatmul.mubr.msk.bf16.vlgmr.msra.gmra.mrb[8].mxu0 %vm456_vm5, %v466_v43 }
 0x304   : > { %v465_v44 = vpop.xlane.xlu0 %464 }
 0x305   : > { %738 = vrcp.f32 %v465_v44 }
 0x30f   : > { %v739_v45 = vpop.eup %738 }
 0x34b   : > { %v508_v46 = vpop.f32.mrb[8].mxu0 }
 0x34c   : > { %v515_v47 = vmul.f32 %v739_v45, %v508_v46  ;;  %v671_v48 = vpop.f32.mrb[9].mxu0 }
 0x34d   : > { %v511_v49 = vpop.f32.mrb[10].mxu0 }
 0x34e   : > { %v672_v50 = vpop.f32.mrb[11].mxu0  ;;  %516 = vst.msk [vmem:[%s202_s7] sm:$0xff] %vm401_vm3, %v515_v47 }
 0x34f   : > { %753 = shalt.err (!%p750_p5)
}
 0x350   : > { %s754_s22 = scalar_lea.hbm %s944_s11, 128  ;;  %s758_s29 = scalar_lea.hbm %s996_s4, 256 }
 0x351   : > { %p755_p6 = scmp.ne.s32.totalorder %s944_s11, %s754_s22  ;;  %p759_p10 = scmp.lt.u32.totalorder %s944_s11, %s996_s4 }
 0x352   : > { %p760_p11 = scmp.lt.u32.totalorder %s758_s29, %s754_s22  ;;  %p762_p13 = scmp.lt.u32.totalorder %s754_s22, %s944_s11 }
 0x353   : > { %p756_p7 = pnand %p755_p6, %p888_p4 }
 0x354   : > { %p761_p12 = por %p760_p11, %p759_p10 }
 0x355   : > { %p757_p9 = pneg %p756_p7 }
 0x356   : > { %p763_p0 = por %p762_p13, %p761_p12 }
 0x358   : > { %p764_p1 = pnand %p763_p0, %p757_p9 }
 0x35a   : > { %767 = shalt.err (!%p764_p1)
}
 0x35b   : > { %673 = dma.vmem_to_hbm [thread:$0]  (%p888_p4), %s946_s8, 128, %s944_s11, %s518_s18  }
 0x35c PF: > { %p679_p2 = scmp.ge.s32.totalorder %s818_s20, 2  ;;  %s544_s6 = sand.u32 1, %s798_s15  }
 0x35d   : > { %s545_s7 = scalar_lea.sflag [#allocation6], %s544_s6 }
 0x35e   : > { %p676_p3 = pnand %p679_p2, %p895_p8 }
 0x360   : > { %793 = dma.done.wait (!%p676_p3), %s545_s7, 128  }
 0x361   : > { %795 = vsyncadd (!%p676_p3), %s545_s7, 4294967168  ;;  %s17_s20 = sadd.s32 1, %s818_s20   ;;  %s999_s15 = smov %s802_s16 }
 0x362   : > { %p14_p5 = scmp.ge.s32.totalorder %s17_s20, 4   ;;  %s1000_s16 = smov %s806_s17 }
 0x363   : > { %s1001_s17 = smov %s901_s28  ;;  %s1002_s18 = smov %s814_s19 }
 0x364   : > { %s1003_s19 = smov %s1005_s23  ;;  %16 = sbr.rel (!%p14_p5) target bundleno = 4 (0x4), region = 76 }
 0x36b   :  { %550 = vsyncpa [#allocation6], 1 }
 0x36c   :  { %552 = vsyncpa [#allocation6 + $0x1], 1 }

</bundles_post_ra>
